<compile_context>
chip_gen: v6e
topology: v6e:2x2x1
jax: 0.10.0
libtpu: 0.0.40
codegen_flags: <defaults>
</compile_context>

<pallas_src>
import math

import jax
import jax.numpy as jnp
from jax.experimental import pallas as pl
from jax.experimental.pallas import tpu as pltpu


def _round_up(x: int, m: int) -> int:
    return ((x + m - 1) // m) * m


def mlp_actor_kernel(obs_ref, w1_ref, b1_ref, w2_ref, b2_ref, w3_ref, b3_ref,
                     out_ref):
    # Observations: use bf16 directly if the caller supplied bf16, otherwise
    # cast per tile (dtype is static at trace time, so this is a Python if).
    x = obs_ref[...]
    if x.dtype != jnp.bfloat16:
        x = x.astype(jnp.bfloat16)

    # fc1 + ReLU (bf16 MXU matmul, f32 accumulation, f32 bias/ReLU).
    h1 = jnp.dot(x, w1_ref[...], preferred_element_type=jnp.float32)
    h1 = jnp.maximum(h1 + b1_ref[...], 0.0)

    # fc2 + ReLU.
    h2 = jnp.dot(h1.astype(jnp.bfloat16), w2_ref[...],
                 preferred_element_type=jnp.float32)
    h2 = jnp.maximum(h2 + b2_ref[...], 0.0)

    # fc3 (policy logits, no activation) — f32 path for closer parity with the
    # PyTorch f32 reference; costs nothing since the kernel is memory-bound.
    policy = jnp.dot(h2, w3_ref[...], preferred_element_type=jnp.float32)
    policy = policy + b3_ref[...]
    out_ref[...] = policy.astype(out_ref.dtype)


def mlp_actor_forward(obs, params, *, tb: int = 512):
    """obs: (B, obs_dim) f32 or bf16. params: dict with w1,b1,w2,b2,w3,b3 (f32).

    Returns (B, n_actions) policy logits, matching the PyTorch module.
    """
    w1, b1 = params["w1"], params["b1"]
    w2, b2 = params["w2"], params["b2"]
    w3, b3 = params["w3"], params["b3"]

    batch, obs_dim = obs.shape
    hidden = w1.shape[1]
    n_actions = w3.shape[1]

    # ---- Lane-dense padding of the hidden dim (exact: zero-padded units). ----
    hid_p = _round_up(max(hidden, 128), 128)

    def pad2(a, rows, cols, dtype):
        return jnp.pad(a, ((0, rows - a.shape[0]),
                           (0, cols - a.shape[1]))).astype(dtype)

    # fc1/fc2 weights in bf16 (DMA'd once; f32 accumulation in kernel).
    w1p = pad2(w1, obs_dim, hid_p, jnp.bfloat16)
    w2p = pad2(w2, hid_p, hid_p, jnp.bfloat16)
    # fc3 weights/bias stay f32 (logits path); only the contracted rows pad.
    w3p = pad2(w3, hid_p, n_actions, jnp.float32)
    b1p = pad2(b1, 1, hid_p, jnp.float32)
    b2p = pad2(b2, 1, hid_p, jnp.float32)
    b3p = b3.reshape(1, n_actions).astype(jnp.float32)

    # ---- Batch tiling. Big tiles amortize per-step overhead, but keep at
    # least 2 grid steps (when the batch allows) so both v7x TensorCores get
    # a tile via the "parallel" batch axis. ----
    tb = _round_up(max(tb, 8), 8)
    batch_r = _round_up(batch, 8)
    tb_eff = min(tb, max(8, _round_up(batch_r // 2, 8)))
    batch_p = _round_up(batch, tb_eff)
    obs_p = obs if batch_p == batch else jnp.pad(
        obs, ((0, batch_p - batch), (0, 0)))
    grid = (batch_p // tb_eff,)

    # VMEM footprint (v7x-safe): double-buffered (tb,obs_dim) input +
    # (tb,n_actions) output tiles plus resident weights — well under the
    # default scoped limit, so no vmem_limit_bytes override is needed.
    out = pl.pallas_call(
        mlp_actor_kernel,
        out_shape=jax.ShapeDtypeStruct((batch_p, n_actions), obs.dtype),
        grid_spec=pltpu.PrefetchScalarGridSpec(
            num_scalar_prefetch=0,
            grid=grid,
            in_specs=[
                pl.BlockSpec((tb_eff, obs_dim), lambda i: (i, 0)),
                # Weights/biases: constant block index -> VMEM-resident,
                # DMA'd once across the whole grid.
                pl.BlockSpec((obs_dim, hid_p), lambda i: (0, 0)),
                pl.BlockSpec((1, hid_p), lambda i: (0, 0)),
                pl.BlockSpec((hid_p, hid_p), lambda i: (0, 0)),
                pl.BlockSpec((1, hid_p), lambda i: (0, 0)),
                pl.BlockSpec((hid_p, n_actions), lambda i: (0, 0)),
                pl.BlockSpec((1, n_actions), lambda i: (0, 0)),
            ],
            # Narrow (n_actions-wide) output block == full array dim: writes
            # only the real logits back to HBM (~16x fewer bytes than a
            # 128-lane padded slab).
            out_specs=pl.BlockSpec((tb_eff, n_actions), lambda i: (i, 0)),
        ),
        compiler_params=pltpu.CompilerParams(
            # Batch tiles are independent -> shard across both TCs on v7x.
            dimension_semantics=("parallel",),
        ),
    )(obs_p, w1p, b1p, w2p, b2p, w3p, b3p)

    # Strip batch padding (lane dim is already exact).
    return out[:batch, :]


def xavier_uniform(key, fan_in, fan_out, gain=1.0, dtype=jnp.float32):
    # Matches torch.nn.init.xavier_uniform_ semantics.
    bound = gain * math.sqrt(6.0 / (fan_in + fan_out))
    # Stored as (fan_in, fan_out) so the kernel does x @ W.
    return jax.random.uniform(key, (fan_in, fan_out), dtype=dtype,
                              minval=-bound, maxval=bound)


def init_params(key, obs_shape, n_actions, hidden_size=64):
    k1, k2, k3 = jax.random.split(key, 3)
    return {
        "w1": xavier_uniform(k1, obs_shape, hidden_size),
        "b1": jnp.zeros((1, hidden_size), jnp.float32),
        "w2": xavier_uniform(k2, hidden_size, hidden_size),
        "b2": jnp.zeros((1, hidden_size), jnp.float32),
        "w3": xavier_uniform(k3, hidden_size, n_actions),
        "b3": jnp.zeros((1, n_actions), jnp.float32),
    }


def reference_forward(obs, params):
    h1 = jnp.maximum(obs @ params["w1"] + params["b1"], 0.0)
    h2 = jnp.maximum(h1 @ params["w2"] + params["b2"], 0.0)
    return h2 @ params["w3"] + params["b3"]


if __name__ == "__main__":
    key = jax.random.PRNGKey(0)
    k_obs, k_params = jax.random.split(key)

    # Small but grid-exercising shapes: batch=512 -> tb_eff=256 -> 2 grid
    # steps (both v7x TCs get a tile).
    batch, obs_shape, n_actions, hidden_size = 512, 16, 8, 64

    obs = jax.random.normal(k_obs, (batch, obs_shape), dtype=jnp.float32)
    params = init_params(k_params, obs_shape, n_actions, hidden_size)

    policy = jax.block_until_ready(mlp_actor_forward(obs, params))

    ref = reference_forward(obs, params)
    assert policy.shape == (batch, n_actions)
    # fc1/fc2 use bf16 MXU inputs with f32 accumulation -> loosened tolerance
    # vs the pure-f32 reference (fc3 itself is f32).
    assert jnp.allclose(policy, ref, atol=5e-2, rtol=5e-2), \
        float(jnp.max(jnp.abs(policy - ref)))

    print("KERNEL_OK")
</pallas_src>

<mosaic_0001>
module attributes {stable_mosaic.version = 11 : i64} {
  func.func @mlp_actor_kernel(%arg0: i32, %arg1: memref<256x16xf32, #tpu.memory_space<vmem>>, %arg2: memref<16x128xbf16, #tpu.memory_space<vmem>>, %arg3: memref<1x128xf32, #tpu.memory_space<vmem>>, %arg4: memref<128x128xbf16, #tpu.memory_space<vmem>>, %arg5: memref<1x128xf32, #tpu.memory_space<vmem>>, %arg6: memref<128x8xf32, #tpu.memory_space<vmem>>, %arg7: memref<1x8xf32, #tpu.memory_space<vmem>>, %arg8: memref<256x8xf32, #tpu.memory_space<vmem>>) attributes {dimension_semantics = [#tpu.dimension_semantics<parallel>], iteration_bounds = array<i64: 2>, scalar_prefetch = 0 : i64, scratch_operands = 0 : i64, tpu.core_type = #tpu.core_type<tc>, window_params = [{transform_indices = @transform_0, window_bounds = array<i64: 256, 16>}, {pipeline_mode = #tpu.pipeline_mode<synchronous>, transform_indices = @transform_1, window_bounds = array<i64: 16, 128>}, {pipeline_mode = #tpu.pipeline_mode<synchronous>, transform_indices = @transform_2, window_bounds = array<i64: 1, 128>}, {pipeline_mode = #tpu.pipeline_mode<synchronous>, transform_indices = @transform_3, window_bounds = array<i64: 128, 128>}, {pipeline_mode = #tpu.pipeline_mode<synchronous>, transform_indices = @transform_4, window_bounds = array<i64: 1, 128>}, {pipeline_mode = #tpu.pipeline_mode<synchronous>, transform_indices = @transform_5, window_bounds = array<i64: 128, 8>}, {pipeline_mode = #tpu.pipeline_mode<synchronous>, transform_indices = @transform_6, window_bounds = array<i64: 1, 8>}, {transform_indices = @transform_7, window_bounds = array<i64: 256, 8>}]} {
    %c0 = arith.constant 0 : index
    %c0_0 = arith.constant 0 : index
    %0 = vector.load %arg1[%c0, %c0_0] : memref<256x16xf32, #tpu.memory_space<vmem>>, vector<256x16xf32>
    %1 = arith.truncf %0 : vector<256x16xf32> to vector<256x16xbf16>
    %c0_1 = arith.constant 0 : index
    %c0_2 = arith.constant 0 : index
    %2 = vector.load %arg2[%c0_1, %c0_2] : memref<16x128xbf16, #tpu.memory_space<vmem>>, vector<16x128xbf16>
    %cst = arith.constant dense<0.000000e+00> : vector<256x128xf32>
    %3 = tpu.matmul %1, %2, %cst {dimension_numbers = #tpu.dot_dimension_numbers<[1], [0], [0], [1], [0, 0, 1, 1], [], []>} : vector<256x16xbf16>, vector<16x128xbf16>, vector<256x128xf32> -> vector<256x128xf32>
    %c0_3 = arith.constant 0 : index
    %c0_4 = arith.constant 0 : index
    %4 = vector.load %arg3[%c0_3, %c0_4] : memref<1x128xf32, #tpu.memory_space<vmem>>, vector<1x128xf32>
    %5 = vector.broadcast %4 : vector<1x128xf32> to vector<256x128xf32>
    %6 = arith.addf %3, %5 : vector<256x128xf32>
    %cst_5 = arith.constant 0.000000e+00 : f32
    %7 = vector.broadcast %cst_5 : f32 to vector<256x128xf32>
    %8 = arith.maximumf %6, %7 : vector<256x128xf32>
    %9 = arith.truncf %8 : vector<256x128xf32> to vector<256x128xbf16>
    %c0_6 = arith.constant 0 : index
    %c0_7 = arith.constant 0 : index
    %10 = vector.load %arg4[%c0_6, %c0_7] : memref<128x128xbf16, #tpu.memory_space<vmem>>, vector<128x128xbf16>
    %cst_8 = arith.constant dense<0.000000e+00> : vector<256x128xf32>
    %11 = tpu.matmul %9, %10, %cst_8 {dimension_numbers = #tpu.dot_dimension_numbers<[1], [0], [0], [1], [0, 0, 1, 1], [], []>} : vector<256x128xbf16>, vector<128x128xbf16>, vector<256x128xf32> -> vector<256x128xf32>
    %c0_9 = arith.constant 0 : index
    %c0_10 = arith.constant 0 : index
    %12 = vector.load %arg5[%c0_9, %c0_10] : memref<1x128xf32, #tpu.memory_space<vmem>>, vector<1x128xf32>
    %13 = vector.broadcast %12 : vector<1x128xf32> to vector<256x128xf32>
    %14 = arith.addf %11, %13 : vector<256x128xf32>
    %cst_11 = arith.constant 0.000000e+00 : f32
    %15 = vector.broadcast %cst_11 : f32 to vector<256x128xf32>
    %16 = arith.maximumf %14, %15 : vector<256x128xf32>
    %c0_12 = arith.constant 0 : index
    %c0_13 = arith.constant 0 : index
    %17 = vector.load %arg6[%c0_12, %c0_13] : memref<128x8xf32, #tpu.memory_space<vmem>>, vector<128x8xf32>
    %cst_14 = arith.constant dense<0.000000e+00> : vector<256x8xf32>
    %18 = tpu.matmul %16, %17, %cst_14 {dimension_numbers = #tpu.dot_dimension_numbers<[1], [0], [0], [1], [0, 0, 1, 1], [], []>} : vector<256x128xf32>, vector<128x8xf32>, vector<256x8xf32> -> vector<256x8xf32>
    %c0_15 = arith.constant 0 : index
    %c0_16 = arith.constant 0 : index
    %19 = vector.load %arg7[%c0_15, %c0_16] : memref<1x8xf32, #tpu.memory_space<vmem>>, vector<1x8xf32>
    %20 = vector.broadcast %19 : vector<1x8xf32> to vector<256x8xf32>
    %21 = arith.addf %18, %20 : vector<256x8xf32>
    %c0_17 = arith.constant 0 : index
    %c0_18 = arith.constant 0 : index
    %22 = vector.load %arg8[%c0_17, %c0_18] : memref<256x8xf32, #tpu.memory_space<vmem>>, vector<256x8xf32>
    tpu.vector_store %arg8[%c0_17, %c0_18], %21 {strides = array<i32>} : memref<256x8xf32, #tpu.memory_space<vmem>>, vector<256x8xf32>,
    return
  }
  func.func @transform_0(%arg0: i32) -> (i32, i32) {
    %c0_i32 = arith.constant 0 : i32
    %c0_i32_0 = arith.constant 0 : i32
    return %arg0, %c0_i32 : i32, i32
  }
  func.func @transform_1(%arg0: i32) -> (i32, i32) {
    %c0_i32 = arith.constant 0 : i32
    %c0_i32_0 = arith.constant 0 : i32
    %c0_i32_1 = arith.constant 0 : i32
    return %c0_i32, %c0_i32_0 : i32, i32
  }
  func.func @transform_2(%arg0: i32) -> (i32, i32) {
    %c0_i32 = arith.constant 0 : i32
    %c0_i32_0 = arith.constant 0 : i32
    %c0_i32_1 = arith.constant 0 : i32
    return %c0_i32, %c0_i32_0 : i32, i32
  }
  func.func @transform_3(%arg0: i32) -> (i32, i32) {
    %c0_i32 = arith.constant 0 : i32
    %c0_i32_0 = arith.constant 0 : i32
    %c0_i32_1 = arith.constant 0 : i32
    return %c0_i32, %c0_i32_0 : i32, i32
  }
  func.func @transform_4(%arg0: i32) -> (i32, i32) {
    %c0_i32 = arith.constant 0 : i32
    %c0_i32_0 = arith.constant 0 : i32
    %c0_i32_1 = arith.constant 0 : i32
    return %c0_i32, %c0_i32_0 : i32, i32
  }
  func.func @transform_5(%arg0: i32) -> (i32, i32) {
    %c0_i32 = arith.constant 0 : i32
    %c0_i32_0 = arith.constant 0 : i32
    %c0_i32_1 = arith.constant 0 : i32
    return %c0_i32, %c0_i32_0 : i32, i32
  }
  func.func @transform_6(%arg0: i32) -> (i32, i32) {
    %c0_i32 = arith.constant 0 : i32
    %c0_i32_0 = arith.constant 0 : i32
    %c0_i32_1 = arith.constant 0 : i32
    return %c0_i32, %c0_i32_0 : i32, i32
  }
  func.func @transform_7(%arg0: i32) -> (i32, i32) {
    %c0_i32 = arith.constant 0 : i32
    %c0_i32_0 = arith.constant 0 : i32
    return %arg0, %c0_i32 : i32, i32
  }
}

</mosaic_0001>

<bundles_post_ra>
// kernel: tpu_custom_call.1
= control target key start
LH: loop header
LB: loop body
LE: loop exit
PB: predicated region body
PF: predicated region fallthrough
CT: control target
= control target key end

     0   :  { %s1562_s24 = smov 0   ;;  %s1903_s0 = inlined_call_operand.vmem [shape: f32[512,16], index: 0, kind: input, shape index: {}]   ;;  %s1904_s1 = inlined_call_operand.vmem [shape: bf16[16,128], index: 1, kind: input, shape index: {}]   ;;  %s1905_s2 = inlined_call_operand.vmem [shape: f32[1,128], index: 2, kind: input, shape index: {}]   ;;  %s1906_s3 = inlined_call_operand.vmem [shape: bf16[128,128], index: 3, kind: input, shape index: {}]   ;;  %s1907_s4 = inlined_call_operand.vmem [shape: f32[1,128], index: 4, kind: input, shape index: {}]   ;;  %s1908_s5 = inlined_call_operand.vmem [shape: f32[128,8], index: 5, kind: input, shape index: {}]   ;;  %s1909_s6 = inlined_call_operand.vmem [shape: f32[1,8], index: 6, kind: input, shape index: {}]   ;;  %s1910_s7 = inlined_call_operand.vmem [shape: f32[512,8], index: 7, kind: output, shape index: {}]  }
   0x1 LB: > { %s1205_s25 = sadd.s32 4294967295, %s1520_s24   ;;  %p1209_p0 = scmp.ge.s32.totalorder %s1520_s24, 1  ;;  %s1520_s24 = sphi %s1562_s24, %s17_s24  }
   0x2   : > { %p238_p1 = scmp.lt.s32.totalorder %s1520_s24, 3 }
   0x4   : > { %p239_p2 = pnand %p1209_p0, %p238_p1 }
   0x5   : > { %s1210_s28 = sshll.u32 (!%p239_p2), %s1205_s25, 5 }
   0x6   : > { %242 = sbr.rel (%p239_p2) target bundleno = 685 (0x2ad), region = 48  ;;  %p271_p3 = scmp.lt.s32.totalorder (!%p239_p2), %s1210_s28, 63 }
   0xb   : > { %v1505_v0 = vld [vmem:[%s1904_s1] sm:$0xff]   ;;  %v1506_v1 = vld [vmem:[%s1906_s3 + $0x38] sm:$0xff]   ;;  %s1912_s28 = smov (!%p271_p3, %s1210_s28), 63  ;;  %vm346_vm0 = vcmask 130048   ;;  %v1507_v23 = vld [vmem:[%s1906_s3 + $0x30] sm:$0xff]   ;;  %vm1116_vm1 = vcmask 64512  }
   0xc   : > { %1333 = vmatprep.subr.bf16.mxu0 %v1505_v0  ;;  %1495 = vmatprep.subr.bf16.mxu1 %v1505_v0  ;;  %s1211_s8 = sshll.u32 %s1912_s28, 3  ;;  %v1508_v29 = vld [vmem:[%s1906_s3 + $0x28] sm:$0xff]   ;;  %v1509_v38 = vld [vmem:[%s1906_s3 + $0x20] sm:$0xff]   ;;  %v1510_v45 = vld [vmem:[%s1906_s3 + $0x18] sm:$0xff]  }
   0xd   : > { %1334 = vmatpush3.bf16.msra.mxu0 %v1505_v0  ;;  %1496 = vmatpush3.bf16.msra.mxu1 %v1505_v0  ;;  %s1584_s11 = scalar_lea.vmem %s1903_s0, %s1211_s8  ;;  %v1511_v54 = vld [vmem:[%s1906_s3 + $0x10] sm:$0xff]   ;;  %v1512_v55 = vld [vmem:[%s1906_s3 + $0x8] sm:$0xff]   ;;  %v1513_v56 = vld [vmem:[%s1906_s3] sm:$0xff]   ;;  %s1802_s27 = scalar_lea.vmem %s1910_s7, %s1211_s8 }
   0xe   : > { %1367 = vmatprep.subr.bf16.mxu1 %v1506_v1  ;;  %v283_v2 = vld [vmem:[%s1584_s11] sm:$0xff]  ;;  %v284_v3 = vld [vmem:[%s1584_s11 + $0x8] sm:$0xff]  ;;  %v285_v4 = vld [vmem:[%s1584_s11 + $0x10] sm:$0xff] }
   0xf   : > { %v315_v5 = vpack.c.bf16 %v284_v3, %v283_v2  ;;  %v286_v6 = vld [vmem:[%s1584_s11 + $0x18] sm:$0xff]  ;;  %v287_v7 = vld [vmem:[%s1584_s11 + $0x20] sm:$0xff]  ;;  %v288_v8 = vld [vmem:[%s1584_s11 + $0x28] sm:$0xff] }
  0x10   : > { %v316_v9 = vpack.c.bf16 %v286_v6, %v285_v4  ;;  %v317_v10 = vpack.c.bf16 %v288_v8, %v287_v7  ;;  %v289_v11 = vld [vmem:[%s1584_s11 + $0x30] sm:$0xff]  ;;  %v290_v12 = vld [vmem:[%s1584_s11 + $0x38] sm:$0xff]  ;;  %v291_v13 = vld [vmem:[%s1584_s11 + $0x40] sm:$0xff] }
  0x11   : > { %1335 = vmatprep.mubr.msk.bf16.mxu0 %vm346_vm0, %v315_v5  ;;  %v292_v14 = vld [vmem:[%s1584_s11 + $0x48] sm:$0xff]  ;;  %v299_v15 = vld [vmem:[%s1584_s11 + $0x80] sm:$0xff]  ;;  %v301_v18 = vld [vmem:[%s1584_s11 + $0x90] sm:$0xff]  ;;  %v318_v24 = vpack.c.bf16 %v290_v12, %v289_v11 }
  0x12   : > { %1336 = vmatmul.mubr.msk.bf16.vlgmr.msra.gmra.mxu0 %vm346_vm0, %v316_v9  ;;  %v300_v16 = vld [vmem:[%s1584_s11 + $0x88] sm:$0xff]  ;;  %v302_v19 = vld [vmem:[%s1584_s11 + $0x98] sm:$0xff]  ;;  %v303_v20 = vld [vmem:[%s1584_s11 + $0xa0] sm:$0xff]  ;;  %v319_v26 = vpack.c.bf16 %v292_v14, %v291_v13 }
  0x13   : > { %1339 = vmatprep.mubr.msk.bf16.mxu0 %vm346_vm0, %v317_v10  ;;  %v323_v17 = vpack.c.bf16 %v300_v16, %v299_v15  ;;  %v324_v21 = vpack.c.bf16 %v302_v19, %v301_v18  ;;  %v304_v22 = vld [vmem:[%s1584_s11 + $0xa8] sm:$0xff]  ;;  %v305_v27 = vld [vmem:[%s1584_s11 + $0xb0] sm:$0xff]  ;;  %v306_v28 = vld [vmem:[%s1584_s11 + $0xb8] sm:$0xff] }
  0x14   : > { %v325_v25 = vpack.c.bf16 %v304_v22, %v303_v20  ;;  %v307_v30 = vld [vmem:[%s1584_s11 + $0xc0] sm:$0xff]  ;;  %v308_v31 = vld [vmem:[%s1584_s11 + $0xc8] sm:$0xff]  ;;  %v293_v32 = vld [vmem:[%s1584_s11 + $0x50] sm:$0xff]  ;;  %v326_v34 = vpack.c.bf16 %v306_v28, %v305_v27 }
  0x15   : > { %1351 = vmatprep.mubr.msk.bf16.mxu1 %vm346_vm0, %v323_v17  ;;  %v294_v33 = vld [vmem:[%s1584_s11 + $0x58] sm:$0xff]  ;;  %v295_v35 = vld [vmem:[%s1584_s11 + $0x60] sm:$0xff]  ;;  %v296_v36 = vld [vmem:[%s1584_s11 + $0x68] sm:$0xff]  ;;  %v327_v37 = vpack.c.bf16 %v308_v31, %v307_v30 }
  0x16   : > { %1352 = vmatmul.mubr.msk.bf16.vlgmr.msra.gmra.mxu1 %vm346_vm0, %v324_v21  ;;  %v320_v39 = vpack.c.bf16 %v294_v33, %v293_v32  ;;  %v321_v40 = vpack.c.bf16 %v296_v36, %v295_v35  ;;  %v309_v41 = vld [vmem:[%s1584_s11 + $0xd0] sm:$0xff]  ;;  %v310_v42 = vld [vmem:[%s1584_s11 + $0xd8] sm:$0xff]  ;;  %v311_v43 = vld [vmem:[%s1584_s11 + $0xe0] sm:$0xff] }
  0x17   : > { %1355 = vmatprep.mubr.msk.bf16.mxu1 %vm346_vm0, %v325_v25  ;;  %1368 = vmatpush3.bf16.msra.mxu1 %v1506_v1  ;;  %v312_v44 = vld [vmem:[%s1584_s11 + $0xe8] sm:$0xff]  ;;  %v297_v46 = vld [vmem:[%s1584_s11 + $0x70] sm:$0xff]  ;;  %v298_v47 = vld [vmem:[%s1584_s11 + $0x78] sm:$0xff]  ;;  %v328_v48 = vpack.c.bf16 %v310_v42, %v309_v41 }
  0x18   : > { %1369 = vmatprep.subr.bf16.mxu1 %v1507_v23  ;;  %v329_v49 = vpack.c.bf16 %v312_v44, %v311_v43  ;;  %v322_v50 = vpack.c.bf16 %v298_v47, %v297_v46  ;;  %v313_v51 = vld [vmem:[%s1584_s11 + $0xf0] sm:$0xff]  ;;  %v314_v52 = vld [vmem:[%s1584_s11 + $0xf8] sm:$0xff]  ;;  %v881_v59 = vld [vmem:[%s1908_s5 + $0x68] sm:$0xff] }
  0x19   : > { %v330_v53 = vpack.c.bf16 %v314_v52, %v313_v51  ;;  %v883_v57 = vld [vmem:[%s1908_s5 + $0x78] sm:$0xff]  ;;  %v882_v58 = vld [vmem:[%s1908_s5 + $0x70] sm:$0xff]  ;;  %v880_v60 = vld [vmem:[%s1908_s5 + $0x60] sm:$0xff] }
  0x1a   : > { %1340 = vmatmul.mubr.msk.bf16.gmra.mxu0 %vm346_vm0, %v318_v24  ;;  %1415 = vmatprep.subr.mxu0 %v883_v57  ;;  %v879_v61 = vld [vmem:[%s1908_s5 + $0x58] sm:$0xff]  ;;  %v878_v62 = vld [vmem:[%s1908_s5 + $0x50] sm:$0xff]  ;;  %v877_v63 = vld [vmem:[%s1908_s5 + $0x48] sm:$0xff] }
  0x1b   : > { %1343 = vmatprep.mubr.msk.bf16.mxu0 %vm346_vm0, %v319_v26  ;;  %1370 = vmatpush3.bf16.msra.mxu1 %v1507_v23  ;;  %v876_v0 = vld [vmem:[%s1908_s5 + $0x40] sm:$0xff]  ;;  %v875_v1 = vld [vmem:[%s1908_s5 + $0x38] sm:$0xff]  ;;  %v874_v2 = vld [vmem:[%s1908_s5 + $0x30] sm:$0xff] }
  0x1c   : > { %1371 = vmatprep.subr.bf16.mxu1 %v1508_v29  ;;  %1416 = vmatpush3.msra.mxu0 %v883_v57  ;;  %v873_v3 = vld [vmem:[%s1908_s5 + $0x28] sm:$0xff]  ;;  %v1691_v6 = vld [vmem:[%s1905_s2] ss:$0 sm:$0xff] }
  0x1d   : > { %1417 = vmatprep.subr.mxu0 %v882_v58 }
  0x1e   : > { %1356 = vmatmul.mubr.msk.bf16.gmra.mxu1 %vm346_vm0, %v326_v34  ;;  %1418 = vmatpush3.msra.mxu0 %v882_v58 }
  0x1f   : > { %1359 = vmatprep.mubr.msk.bf16.mxu1 %vm346_vm0, %v327_v37  ;;  %1372 = vmatpush3.bf16.msra.mxu1 %v1508_v29 }
  0x20   : > { %1373 = vmatprep.subr.bf16.mxu1 %v1509_v38  ;;  %1419 = vmatprep.subr.mxu0 %v881_v59 }
  0x21   : > { %1420 = vmatpush3.msra.mxu0 %v881_v59 }
  0x22   : > { %1344 = vmatmul.mubr.msk.bf16.gmra.mxu0 %vm346_vm0, %v320_v39  ;;  %1421 = vmatprep.subr.mxu0 %v880_v60 }
  0x23   : > { %1347 = vmatprep.mubr.msk.bf16.mxu0 %vm346_vm0, %v321_v40  ;;  %1374 = vmatpush3.bf16.msra.mxu1 %v1509_v38 }
  0x24   : > { %1375 = vmatprep.subr.bf16.mxu1 %v1510_v45  ;;  %1422 = vmatpush3.msra.mxu0 %v880_v60 }
  0x25   : > { %1423 = vmatprep.subr.mxu0 %v879_v61 }
  0x26   : > { %1360 = vmatmul.mubr.msk.bf16.gmra.mxu1 %vm346_vm0, %v328_v48  ;;  %1424 = vmatpush3.msra.mxu0 %v879_v61 }
  0x27   : > { %1363 = vmatprep.mubr.msk.bf16.mxu1 %vm346_vm0, %v329_v49  ;;  %1376 = vmatpush3.bf16.msra.mxu1 %v1510_v45 }
  0x28   : > { %1377 = vmatprep.subr.bf16.mxu1 %v1511_v54  ;;  %1425 = vmatprep.subr.mxu0 %v878_v62 }
  0x29   : > { %1426 = vmatpush3.msra.mxu0 %v878_v62 }
  0x2a   : > { %1348 = vmatmul.mubr.msk.bf16.gmra.mxu0 %vm346_vm0, %v322_v50  ;;  %1427 = vmatprep.subr.mxu0 %v877_v63 }
  0x2b   : > { %1378 = vmatpush3.bf16.msra.mxu1 %v1511_v54  ;;  %1428 = vmatpush3.msra.mxu0 %v877_v63 }
  0x2c   : > { %1379 = vmatprep.subr.bf16.mxu1 %v1512_v55  ;;  %1429 = vmatprep.subr.mxu0 %v876_v0 }
  0x2d   : > { %1430 = vmatpush3.msra.mxu0 %v876_v0 }
  0x2e   : > { %1364 = vmatmul.mubr.msk.bf16.gmra.mxu1 %vm346_vm0, %v330_v53  ;;  %1431 = vmatprep.subr.mxu0 %v875_v1 }
  0x2f   : > { %1380 = vmatpush3.bf16.msra.mxu1 %v1512_v55  ;;  %1432 = vmatpush3.msra.mxu0 %v875_v1 }
  0x30   : > { %1381 = vmatprep.subr.bf16.mxu1 %v1513_v56  ;;  %1433 = vmatprep.subr.mxu0 %v874_v2 }
  0x31   : > { %1434 = vmatpush3.msra.mxu0 %v874_v2 }
  0x32   : > { %1435 = vmatprep.subr.mxu0 %v873_v3 }
  0x33   : > { %1382 = vmatpush3.bf16.msra.mxu1 %v1513_v56  ;;  %1436 = vmatpush3.msra.mxu0 %v873_v3 }
  0xd2   : > { %v1337_v4 = vpop.f32.mrf.mxu0 }
  0xd3   : > { %v438_v11 = vadd.f32 %v1337_v4, %v1691_v6 }
  0xd4   : > { %v429_v5 = vpop.f32.mrf.mxu0 }
  0xd5   : > { %v430_v8 = vadd.f32 %v1691_v6, %v429_v5  ;;  %v558_v20 = vmax.f32 %v438_v11, 0.0 }
  0xd6   : > { %v1338_v7 = vpop.f32.mrf.mxu0  ;;  %v1695_v10 = vpop.f32.mrf.mxu1 }
  0xd7   : > { %v441_v9 = vadd.f32 %v1338_v7, %v1691_v6  ;;  %v556_v17 = vmax.f32 %v430_v8, 0.0 }
  0xd8   : > { %v432_v12 = vpop.f32.mrf.mxu0  ;;  %v493_v14 = vpop.f32.mrf.mxu1 }
  0xd9   : > { %v433_v13 = vadd.f32 %v1691_v6, %v432_v12  ;;  %v559_v15 = vmax.f32 %v441_v9, 0.0  ;;  %v494_v58 = vadd.f32 %v1691_v6, %v493_v14 }
  0xda   : > { %v1341_v16 = vpop.f32.mrf.mxu0  ;;  %v1699_v19 = vpop.f32.mrf.mxu1 }
  0xdb   : > { %v557_v18 = vmax.f32 %v433_v13, 0.0  ;;  %v589_v24 = vpack.c.bf16 %v559_v15, %v558_v20  ;;  %v454_v29 = vadd.f32 %v1341_v16, %v1691_v6  ;;  %v572_v3 = vmax.f32 %v494_v58, 0.0 }
  0xdc   : > { %v445_v21 = vpop.f32.mrf.mxu0  ;;  %v496_v23 = vpop.f32.mrf.mxu1  ;;  %v505_v20 = vadd.f32 %v1699_v19, %v1691_v6 }
  0xdd   : > { %v588_v22 = vpack.c.bf16 %v557_v18, %v556_v17  ;;  %v446_v26 = vadd.f32 %v1691_v6, %v445_v21  ;;  %v562_v38 = vmax.f32 %v454_v29, 0.0  ;;  %v497_v59 = vadd.f32 %v1691_v6, %v496_v23 }
  0xde   : > { %v1342_v25 = vpop.f32.mrf.mxu0  ;;  %v1703_v28 = vpop.f32.mrf.mxu1  ;;  %v502_v17 = vadd.f32 %v1695_v10, %v1691_v6 }
  0xdf   : > { %v457_v27 = vadd.f32 %v1342_v25, %v1691_v6  ;;  %1383 = vmatprep.mubr.bf16.mxu1 %v588_v22  ;;  %v560_v35 = vmax.f32 %v446_v26, 0.0  ;;  %v573_v5 = vmax.f32 %v497_v59, 0.0  ;;  %v575_v25 = vmax.f32 %v505_v20, 0.0  ;;  %v1758_v59 = vld [vmem:[%s1907_s4] ss:$0 sm:$0xff] }
  0xe0   : > { %v448_v30 = vpop.f32.mrf.mxu0  ;;  %1384 = vmatmul.mubr.bf16.vlgmr.msra.gmra.mxu1 %v589_v24  ;;  %v509_v32 = vpop.f32.mrf.mxu1  ;;  %v574_v24 = vmax.f32 %v502_v17, 0.0  ;;  %v518_v10 = vadd.f32 %v1703_v28, %v1691_v6 }
  0xe1   : > { %v449_v31 = vadd.f32 %v1691_v6, %v448_v30  ;;  %v563_v33 = vmax.f32 %v457_v27, 0.0  ;;  %v596_v14 = vpack.c.bf16 %v573_v5, %v572_v3  ;;  %v510_v15 = vadd.f32 %v1691_v6, %v509_v32 }
  0xe2   : > { %v1345_v34 = vpop.f32.mrf.mxu0  ;;  %v1707_v37 = vpop.f32.mrf.mxu1 }
  0xe3   : > { %v561_v36 = vmax.f32 %v449_v31, 0.0  ;;  %v591_v42 = vpack.c.bf16 %v563_v33, %v562_v38  ;;  %v470_v47 = vadd.f32 %v1345_v34, %v1691_v6  ;;  %v576_v22 = vmax.f32 %v510_v15, 0.0 }
  0xe4   : > { %v461_v39 = vpop.f32.mrf.mxu0  ;;  %v512_v41 = vpop.f32.mrf.mxu1  ;;  %v597_v31 = vpack.c.bf16 %v575_v25, %v574_v24  ;;  %v521_v19 = vadd.f32 %v1707_v37, %v1691_v6 }
  0xe5   : > { %v590_v40 = vpack.c.bf16 %v561_v36, %v560_v35  ;;  %v462_v44 = vadd.f32 %v1691_v6, %v461_v39  ;;  %v566_v55 = vmax.f32 %v470_v47, 0.0  ;;  %v513_v16 = vadd.f32 %v1691_v6, %v512_v41 }
  0xe6   : > { %v1346_v43 = vpop.f32.mrf.mxu0  ;;  %v1711_v46 = vpop.f32.mrf.mxu1  ;;  %v578_v35 = vmax.f32 %v518_v10, 0.0  ;;  %v579_v36 = vmax.f32 %v521_v19, 0.0 }
  0xe7   : > { %v473_v45 = vadd.f32 %v1346_v43, %v1691_v6  ;;  %1387 = vmatprep.mubr.bf16.mxu1 %v590_v40  ;;  %v564_v53 = vmax.f32 %v462_v44, 0.0  ;;  %v577_v23 = vmax.f32 %v513_v16, 0.0  ;;  %v534_v28 = vadd.f32 %v1711_v46, %v1691_v6  ;;  %v872_v46 = vld [vmem:[%s1908_s5 + $0x20] sm:$0xff] }
  0xe8   : > { %v464_v48 = vpop.f32.mrf.mxu0  ;;  %1388 = vmatmul.mubr.bf16.gmra.mxu1 %v591_v42  ;;  %v525_v52 = vpop.f32.mrf.mxu1  ;;  %v599_v42 = vpack.c.bf16 %v579_v36, %v578_v35  ;;  %1437 = vmatprep.subr.mxu0 %v872_v46 }
  0xe9   : > { %v465_v49 = vadd.f32 %v1691_v6, %v464_v48  ;;  %v567_v50 = vmax.f32 %v473_v45, 0.0  ;;  %v598_v27 = vpack.c.bf16 %v577_v23, %v576_v22  ;;  %v526_v29 = vadd.f32 %v1691_v6, %v525_v52  ;;  %1438 = vmatpush3.msra.mxu0 %v872_v46 }
  0xea   : > { %v1349_v51 = vpop.f32.mrf.mxu0  ;;  %v1362_v62 = vpop.f32.mrf.mxu1  ;;  %v582_v45 = vmax.f32 %v534_v28, 0.0 }
  0xeb   : > { %v565_v54 = vmax.f32 %v465_v49, 0.0  ;;  %v593_v60 = vpack.c.bf16 %v567_v50, %v566_v55  ;;  %v486_v1 = vadd.f32 %v1349_v51, %v1691_v6  ;;  %v580_v33 = vmax.f32 %v526_v29, 0.0  ;;  %v871_v55 = vld [vmem:[%s1908_s5 + $0x18] sm:$0xff] }
  0xec   : > { %v477_v56 = vpop.f32.mrf.mxu0  ;;  %v528_v8 = vpop.f32.mrf.mxu1  ;;  %v537_v43 = vadd.f32 %v1362_v62, %v1691_v6  ;;  %1439 = vmatprep.subr.mxu0 %v871_v55 }
  0xed   : > { %v592_v57 = vpack.c.bf16 %v565_v54, %v564_v53  ;;  %v478_v63 = vadd.f32 %v1691_v6, %v477_v56  ;;  %v570_v12 = vmax.f32 %v486_v1, 0.0  ;;  %v529_v30 = vadd.f32 %v1691_v6, %v528_v8  ;;  %1440 = vmatpush3.msra.mxu0 %v871_v55  ;;  %v869_v56 = vld [vmem:[%s1908_s5 + $0x8] sm:$0xff] }
  0xee   : > { %v1350_v61 = vpop.f32.mrf.mxu0  ;;  %v1365_v21 = vpop.f32.mrf.mxu1  ;;  %v583_v47 = vmax.f32 %v537_v43, 0.0 }
  0xef   : > { %v489_v0 = vadd.f32 %v1350_v61, %v1691_v6  ;;  %1391 = vmatprep.mubr.bf16.mxu1 %v592_v57  ;;  %v568_v9 = vmax.f32 %v478_v63, 0.0  ;;  %v581_v34 = vmax.f32 %v529_v30, 0.0  ;;  %v550_v50 = vadd.f32 %v1365_v21, %v1691_v6  ;;  %v868_v57 = vld [vmem:[%s1908_s5] sm:$0xff] }
  0xf0   : > { %v480_v2 = vpop.f32.mrf.mxu0  ;;  %1392 = vmatmul.mubr.bf16.gmra.mxu1 %v593_v60  ;;  %v541_v26 = vpop.f32.mrf.mxu1  ;;  %v601_v49 = vpack.c.bf16 %v583_v47, %v582_v45 }
  0xf1   : > { %v481_v4 = vadd.f32 %v1691_v6, %v480_v2  ;;  %v571_v7 = vmax.f32 %v489_v0, 0.0  ;;  %v600_v39 = vpack.c.bf16 %v581_v34, %v580_v33  ;;  %v542_v40 = vadd.f32 %v1691_v6, %v541_v26 }
  0xf2   : > { %v1366_v32 = vpop.f32.mrf.mxu1  ;;  %v586_v52 = vmax.f32 %v550_v50, 0.0 }
  0xf3   : > { %v569_v11 = vmax.f32 %v481_v4, 0.0  ;;  %v595_v18 = vpack.c.bf16 %v571_v7, %v570_v12  ;;  %v584_v37 = vmax.f32 %v542_v40, 0.0  ;;  %v553_v51 = vadd.f32 %v1366_v32, %v1691_v6 }
  0xf4   : > { %v544_v38 = vpop.f32.mrf.mxu1 }
  0xf5   : > { %v594_v13 = vpack.c.bf16 %v569_v11, %v568_v9  ;;  %v545_v41 = vadd.f32 %v1691_v6, %v544_v38  ;;  %v587_v53 = vmax.f32 %v553_v51, 0.0  ;;  %v870_v6 = vld [vmem:[%s1908_s5 + $0x10] sm:$0xff] }
  0xf6   : > { %1441 = vmatprep.subr.mxu0 %v870_v6 }
  0xf7   : > { %1395 = vmatprep.mubr.bf16.mxu1 %v594_v13  ;;  %v585_v44 = vmax.f32 %v545_v41, 0.0  ;;  %v603_v54 = vpack.c.bf16 %v587_v53, %v586_v52  ;;  %1442 = vmatpush3.msra.mxu0 %v870_v6 }
  0xf8   : > { %1396 = vmatmul.mubr.bf16.gmra.mxu1 %v595_v18  ;;  %1443 = vmatprep.subr.mxu0 %v869_v56 }
  0xf9   : > { %1399 = vmatprep.mubr.bf16.mxu1 %v596_v14  ;;  %v602_v48 = vpack.c.bf16 %v585_v44, %v584_v37  ;;  %1444 = vmatpush3.msra.mxu0 %v869_v56 }
  0xfa   : > { %1445 = vmatprep.subr.mxu0 %v868_v57 }
  0xfb   : > { %1446 = vmatpush3.msra.mxu0 %v868_v57 }
 0x100   : > { %1400 = vmatmul.mubr.bf16.gmra.mxu1 %v597_v31 }
 0x101   : > { %1403 = vmatprep.mubr.bf16.mxu1 %v598_v27 }
 0x108   : > { %1404 = vmatmul.mubr.bf16.gmra.mxu1 %v599_v42 }
 0x109   : > { %1407 = vmatprep.mubr.bf16.mxu1 %v600_v39 }
 0x110   : > { %1408 = vmatmul.mubr.bf16.gmra.mxu1 %v601_v49 }
 0x111   : > { %1411 = vmatprep.mubr.bf16.mxu1 %v602_v48 }
 0x118   : > { %1412 = vmatmul.mubr.bf16.gmra.mxu1 %v603_v54 }
 0x1a0   : > { %v1385_v58 = vpop.f32.mrf.mxu1 }
 0x1a1   : > { %v718_v0 = vadd.f32 %v1385_v58, %v1758_v59 }
 0x1a2   : > { %v709_v60 = vpop.f32.mrf.mxu1 }
 0x1a3   : > { %v710_v61 = vadd.f32 %v1758_v59, %v709_v60  ;;  %v838_v7 = vmax.f32 %v718_v0, 0.0 }
 0x1a4   : > { %v1386_v62 = vpop.f32.mrf.mxu1 }
 0x1a5   : > { %v836_v63 = vmax.f32 %v710_v61, 0.0  ;;  %v721_v4 = vadd.f32 %v1386_v62, %v1758_v59 }
 0x1a6   : > { %v712_v1 = vpop.f32.mrf.mxu1 }
 0x1a7   : > { %v713_v2 = vadd.f32 %v1758_v59, %v712_v1  ;;  %1447 = vmatprep.mubr.f32.mxu0 %v836_v63  ;;  %v839_v12 = vmax.f32 %v721_v4, 0.0 }
 0x1a8   : > { %v1389_v3 = vpop.f32.mrf.mxu1 }
 0x1a9   : > { %v837_v5 = vmax.f32 %v713_v2, 0.0  ;;  %v734_v14 = vadd.f32 %v1389_v3, %v1758_v59 }
 0x1aa   : > { %v725_v8 = vpop.f32.mrf.mxu1 }
 0x1ab   : > { %v726_v9 = vadd.f32 %v1758_v59, %v725_v8  ;;  %1448 = vmatmul.mubr.f32.vlgmr.msra.gmra.mxu0 %v837_v5  ;;  %v842_v21 = vmax.f32 %v734_v14, 0.0 }
 0x1ac   : > { %v1390_v11 = vpop.f32.mrf.mxu1  ;;  %1450 = vmatprep.mubr.f32.mxu0 %v838_v7 }
 0x1ad   : > { %v840_v13 = vmax.f32 %v726_v9, 0.0  ;;  %v737_v18 = vadd.f32 %v1390_v11, %v1758_v59 }
 0x1ae   : > { %v728_v15 = vpop.f32.mrf.mxu1 }
 0x1af   : > { %v729_v16 = vadd.f32 %v1758_v59, %v728_v15  ;;  %1451 = vmatmul.mubr.f32.gmra.mxu0 %v839_v12  ;;  %v843_v25 = vmax.f32 %v737_v18, 0.0 }
 0x1b0   : > { %v1393_v17 = vpop.f32.mrf.mxu1  ;;  %1453 = vmatprep.mubr.f32.mxu0 %v840_v13 }
 0x1b1   : > { %v841_v20 = vmax.f32 %v729_v16, 0.0  ;;  %v750_v27 = vadd.f32 %v1393_v17, %v1758_v59 }
 0x1b2   : > { %v741_v22 = vpop.f32.mrf.mxu1 }
 0x1b3   : > { %v742_v23 = vadd.f32 %v1758_v59, %v741_v22  ;;  %1454 = vmatmul.mubr.f32.gmra.mxu0 %v841_v20  ;;  %v846_v32 = vmax.f32 %v750_v27, 0.0 }
 0x1b4   : > { %v1394_v24 = vpop.f32.mrf.mxu1  ;;  %1456 = vmatprep.mubr.f32.mxu0 %v842_v21 }
 0x1b5   : > { %v844_v26 = vmax.f32 %v742_v23, 0.0  ;;  %v753_v10 = vadd.f32 %v1394_v24, %v1758_v59 }
 0x1b6   : > { %v744_v29 = vpop.f32.mrf.mxu1 }
 0x1b7   : > { %v745_v30 = vadd.f32 %v1758_v59, %v744_v29  ;;  %1457 = vmatmul.mubr.f32.gmra.mxu0 %v843_v25  ;;  %v847_v36 = vmax.f32 %v753_v10, 0.0  ;;  %v1795_v10 = vld [vmem:[%s1909_s6] ss:$0 sm:$0xff] }
 0x1b8   : > { %v1397_v31 = vpop.f32.mrf.mxu1  ;;  %1459 = vmatprep.mubr.f32.mxu0 %v844_v26 }
 0x1b9   : > { %v845_v19 = vmax.f32 %v745_v30, 0.0  ;;  %v766_v39 = vadd.f32 %v1397_v31, %v1758_v59 }
 0x1ba   : > { %v757_v33 = vpop.f32.mrf.mxu1 }
 0x1bb   : > { %v758_v34 = vadd.f32 %v1758_v59, %v757_v33  ;;  %1460 = vmatmul.mubr.f32.gmra.mxu0 %v845_v19  ;;  %v850_v37 = vmax.f32 %v766_v39, 0.0 }
 0x1bc   : > { %v1398_v35 = vpop.f32.mrf.mxu1  ;;  %1462 = vmatprep.mubr.f32.mxu0 %v846_v32 }
 0x1bd   : > { %v848_v38 = vmax.f32 %v758_v34, 0.0  ;;  %v769_v28 = vadd.f32 %v1398_v35, %v1758_v59 }
 0x1be   : > { %v760_v40 = vpop.f32.mrf.mxu1 }
 0x1bf   : > { %v761_v41 = vadd.f32 %v1758_v59, %v760_v40  ;;  %1463 = vmatmul.mubr.f32.gmra.mxu0 %v847_v36  ;;  %v851_v48 = vmax.f32 %v769_v28, 0.0 }
 0x1c0   : > { %v1401_v42 = vpop.f32.mrf.mxu1  ;;  %1465 = vmatprep.mubr.f32.mxu0 %v848_v38 }
 0x1c1   : > { %v849_v43 = vmax.f32 %v761_v41, 0.0  ;;  %v782_v50 = vadd.f32 %v1401_v42, %v1758_v59 }
 0x1c2   : > { %v773_v44 = vpop.f32.mrf.mxu1 }
 0x1c3   : > { %v774_v45 = vadd.f32 %v1758_v59, %v773_v44  ;;  %1466 = vmatmul.mubr.f32.gmra.mxu0 %v849_v43  ;;  %v854_v55 = vmax.f32 %v782_v50, 0.0 }
 0x1c4   : > { %v1402_v47 = vpop.f32.mrf.mxu1  ;;  %1468 = vmatprep.mubr.f32.mxu0 %v850_v37 }
 0x1c5   : > { %v852_v49 = vmax.f32 %v774_v45, 0.0  ;;  %v785_v54 = vadd.f32 %v1402_v47, %v1758_v59 }
 0x1c6   : > { %v776_v51 = vpop.f32.mrf.mxu1 }
 0x1c7   : > { %v777_v52 = vadd.f32 %v1758_v59, %v776_v51  ;;  %1469 = vmatmul.mubr.f32.gmra.mxu0 %v851_v48  ;;  %v855_v58 = vmax.f32 %v785_v54, 0.0 }
 0x1c8   : > { %v1405_v53 = vpop.f32.mrf.mxu1  ;;  %1471 = vmatprep.mubr.f32.mxu0 %v852_v49 }
 0x1c9   : > { %v853_v46 = vmax.f32 %v777_v52, 0.0  ;;  %v798_v61 = vadd.f32 %v1405_v53, %v1758_v59 }
 0x1ca   : > { %v789_v6 = vpop.f32.mrf.mxu1 }
 0x1cb   : > { %v790_v56 = vadd.f32 %v1758_v59, %v789_v6  ;;  %1472 = vmatmul.mubr.f32.gmra.mxu0 %v853_v46  ;;  %v858_v3 = vmax.f32 %v798_v61, 0.0 }
 0x1cc   : > { %v1406_v57 = vpop.f32.mrf.mxu1  ;;  %1474 = vmatprep.mubr.f32.mxu0 %v854_v55 }
 0x1cd   : > { %v856_v60 = vmax.f32 %v790_v56, 0.0  ;;  %v801_v1 = vadd.f32 %v1406_v57, %v1758_v59 }
 0x1ce   : > { %v792_v62 = vpop.f32.mrf.mxu1 }
 0x1cf   : > { %v793_v63 = vadd.f32 %v1758_v59, %v792_v62  ;;  %1475 = vmatmul.mubr.f32.gmra.mxu0 %v855_v58  ;;  %v859_v8 = vmax.f32 %v801_v1, 0.0 }
 0x1d0   : > { %v1409_v0 = vpop.f32.mrf.mxu1  ;;  %1477 = vmatprep.mubr.f32.mxu0 %v856_v60 }
 0x1d1   : > { %v857_v2 = vmax.f32 %v793_v63, 0.0  ;;  %v814_v11 = vadd.f32 %v1409_v0, %v1758_v59 }
 0x1d2   : > { %v805_v4 = vpop.f32.mrf.mxu1 }
 0x1d3   : > { %v806_v5 = vadd.f32 %v1758_v59, %v805_v4  ;;  %1478 = vmatmul.mubr.f32.gmra.mxu0 %v857_v2  ;;  %v862_v17 = vmax.f32 %v814_v11, 0.0 }
 0x1d4   : > { %v1410_v7 = vpop.f32.mrf.mxu1  ;;  %1480 = vmatprep.mubr.f32.mxu0 %v858_v3 }
 0x1d5   : > { %v860_v9 = vmax.f32 %v806_v5, 0.0  ;;  %v817_v15 = vadd.f32 %v1410_v7, %v1758_v59 }
 0x1d6   : > { %v808_v12 = vpop.f32.mrf.mxu1 }
 0x1d7   : > { %v809_v13 = vadd.f32 %v1758_v59, %v808_v12  ;;  %1481 = vmatmul.mubr.f32.gmra.mxu0 %v859_v8  ;;  %v863_v22 = vmax.f32 %v817_v15, 0.0 }
 0x1d8   : > { %v1413_v14 = vpop.f32.mrf.mxu1  ;;  %1483 = vmatprep.mubr.f32.mxu0 %v860_v9 }
 0x1d9   : > { %v861_v16 = vmax.f32 %v809_v13, 0.0  ;;  %v830_v24 = vadd.f32 %v1413_v14, %v1758_v59 }
 0x1da   : > { %v821_v18 = vpop.f32.mrf.mxu1 }
 0x1db   : > { %v822_v20 = vadd.f32 %v1758_v59, %v821_v18  ;;  %1484 = vmatmul.mubr.f32.gmra.mxu0 %v861_v16  ;;  %v866_v30 = vmax.f32 %v830_v24, 0.0 }
 0x1dc   : > { %v1414_v21 = vpop.f32.mrf.mxu1  ;;  %1486 = vmatprep.mubr.f32.mxu0 %v862_v17 }
 0x1dd   : > { %v864_v23 = vmax.f32 %v822_v20, 0.0  ;;  %v833_v27 = vadd.f32 %v1414_v21, %v1758_v59 }
 0x1de   : > { %v824_v25 = vpop.f32.mrf.mxu1 }
 0x1df   : > { %v825_v26 = vadd.f32 %v1758_v59, %v824_v25  ;;  %1487 = vmatmul.mubr.f32.gmra.mxu0 %v863_v22  ;;  %v867_v31 = vmax.f32 %v833_v27, 0.0 }
 0x1e0   : > { %1489 = vmatprep.mubr.f32.mxu0 %v864_v23 }
 0x1e1   : > { %v865_v29 = vmax.f32 %v825_v26, 0.0 }
 0x1e3   : > { %1490 = vmatmul.mubr.f32.gmra.mxu0 %v865_v29 }
 0x1e4   : > { %1492 = vmatprep.mubr.f32.mxu0 %v866_v30 }
 0x1e7   : > { %1493 = vmatmul.mubr.f32.gmra.mxu0 %v867_v31 }
 0x26b   : > { %v1449_v59 = vpop.f32.mrf.mxu0 }
 0x26c   : > { %v963_v19 = vadd.f32 %v1449_v59, %v1795_v10 }
 0x26d   : > { %v957_v32 = vpop.f32.mrf.mxu0 }
 0x26e   : > { %1118 = vst.msk [vmem:[%s1802_s27 + $0x8] sm:$0xff] %vm1116_vm1, %v963_v19  ;;  %v958_v33 = vadd.f32 %v1795_v10, %v957_v32 }
 0x26f   : > { %v1452_v34 = vpop.f32.mrf.mxu0 }
 0x270   : > { %1117 = vst.msk [vmem:[%s1802_s27] sm:$0xff] %vm1116_vm1, %v958_v33  ;;  %v973_v35 = vadd.f32 %v1452_v34, %v1795_v10 }
 0x271   : > { %v967_v36 = vpop.f32.mrf.mxu0 }
 0x272   : > { %1120 = vst.msk [vmem:[%s1802_s27 + $0x18] sm:$0xff] %vm1116_vm1, %v973_v35  ;;  %v968_v38 = vadd.f32 %v1795_v10, %v967_v36 }
 0x273   : > { %v1455_v39 = vpop.f32.mrf.mxu0 }
 0x274   : > { %1119 = vst.msk [vmem:[%s1802_s27 + $0x10] sm:$0xff] %vm1116_vm1, %v968_v38  ;;  %v983_v40 = vadd.f32 %v1455_v39, %v1795_v10 }
 0x275   : > { %v977_v41 = vpop.f32.mrf.mxu0 }
 0x276   : > { %1122 = vst.msk [vmem:[%s1802_s27 + $0x28] sm:$0xff] %vm1116_vm1, %v983_v40  ;;  %v978_v42 = vadd.f32 %v1795_v10, %v977_v41 }
 0x277   : > { %v1458_v28 = vpop.f32.mrf.mxu0 }
 0x278   : > { %1121 = vst.msk [vmem:[%s1802_s27 + $0x20] sm:$0xff] %vm1116_vm1, %v978_v42  ;;  %v993_v43 = vadd.f32 %v1458_v28, %v1795_v10 }
 0x279   : > { %v987_v37 = vpop.f32.mrf.mxu0 }
 0x27a   : > { %1124 = vst.msk [vmem:[%s1802_s27 + $0x38] sm:$0xff] %vm1116_vm1, %v993_v43  ;;  %v988_v44 = vadd.f32 %v1795_v10, %v987_v37 }
 0x27b   : > { %v1461_v45 = vpop.f32.mrf.mxu0 }
 0x27c   : > { %1123 = vst.msk [vmem:[%s1802_s27 + $0x30] sm:$0xff] %vm1116_vm1, %v988_v44  ;;  %v1003_v47 = vadd.f32 %v1461_v45, %v1795_v10 }
 0x27d   : > { %v997_v48 = vpop.f32.mrf.mxu0 }
 0x27e   : > { %1126 = vst.msk [vmem:[%s1802_s27 + $0x48] sm:$0xff] %vm1116_vm1, %v1003_v47  ;;  %v998_v49 = vadd.f32 %v1795_v10, %v997_v48 }
 0x27f   : > { %v1464_v50 = vpop.f32.mrf.mxu0 }
 0x280   : > { %1125 = vst.msk [vmem:[%s1802_s27 + $0x40] sm:$0xff] %vm1116_vm1, %v998_v49  ;;  %v1013_v51 = vadd.f32 %v1464_v50, %v1795_v10 }
 0x281   : > { %v1007_v52 = vpop.f32.mrf.mxu0 }
 0x282   : > { %1128 = vst.msk [vmem:[%s1802_s27 + $0x58] sm:$0xff] %vm1116_vm1, %v1013_v51  ;;  %v1008_v53 = vadd.f32 %v1795_v10, %v1007_v52 }
 0x283   : > { %v1467_v54 = vpop.f32.mrf.mxu0 }
 0x284   : > { %1127 = vst.msk [vmem:[%s1802_s27 + $0x50] sm:$0xff] %vm1116_vm1, %v1008_v53  ;;  %v1023_v46 = vadd.f32 %v1467_v54, %v1795_v10 }
 0x285   : > { %v1017_v55 = vpop.f32.mrf.mxu0 }
 0x286   : > { %1130 = vst.msk [vmem:[%s1802_s27 + $0x68] sm:$0xff] %vm1116_vm1, %v1023_v46  ;;  %v1018_v6 = vadd.f32 %v1795_v10, %v1017_v55 }
 0x287   : > { %v1470_v56 = vpop.f32.mrf.mxu0 }
 0x288   : > { %1129 = vst.msk [vmem:[%s1802_s27 + $0x60] sm:$0xff] %vm1116_vm1, %v1018_v6  ;;  %v1033_v57 = vadd.f32 %v1470_v56, %v1795_v10 }
 0x289   : > { %v1027_v58 = vpop.f32.mrf.mxu0 }
 0x28a   : > { %1132 = vst.msk [vmem:[%s1802_s27 + $0x78] sm:$0xff] %vm1116_vm1, %v1033_v57  ;;  %v1028_v60 = vadd.f32 %v1795_v10, %v1027_v58 }
 0x28b   : > { %v1473_v61 = vpop.f32.mrf.mxu0 }
 0x28c   : > { %1131 = vst.msk [vmem:[%s1802_s27 + $0x70] sm:$0xff] %vm1116_vm1, %v1028_v60  ;;  %v1043_v62 = vadd.f32 %v1473_v61, %v1795_v10 }
 0x28d   : > { %v1037_v63 = vpop.f32.mrf.mxu0 }
 0x28e   : > { %1134 = vst.msk [vmem:[%s1802_s27 + $0x88] sm:$0xff] %vm1116_vm1, %v1043_v62  ;;  %v1038_v0 = vadd.f32 %v1795_v10, %v1037_v63 }
 0x28f   : > { %v1476_v1 = vpop.f32.mrf.mxu0 }
 0x290   : > { %1133 = vst.msk [vmem:[%s1802_s27 + $0x80] sm:$0xff] %vm1116_vm1, %v1038_v0  ;;  %v1053_v2 = vadd.f32 %v1476_v1, %v1795_v10 }
 0x291   : > { %v1047_v3 = vpop.f32.mrf.mxu0 }
 0x292   : > { %1136 = vst.msk [vmem:[%s1802_s27 + $0x98] sm:$0xff] %vm1116_vm1, %v1053_v2  ;;  %v1048_v4 = vadd.f32 %v1795_v10, %v1047_v3 }
 0x293   : > { %v1479_v5 = vpop.f32.mrf.mxu0 }
 0x294   : > { %1135 = vst.msk [vmem:[%s1802_s27 + $0x90] sm:$0xff] %vm1116_vm1, %v1048_v4  ;;  %v1063_v7 = vadd.f32 %v1479_v5, %v1795_v10 }
 0x295   : > { %v1057_v8 = vpop.f32.mrf.mxu0 }
 0x296   : > { %1138 = vst.msk [vmem:[%s1802_s27 + $0xa8] sm:$0xff] %vm1116_vm1, %v1063_v7  ;;  %v1058_v9 = vadd.f32 %v1795_v10, %v1057_v8 }
 0x297   : > { %v1482_v11 = vpop.f32.mrf.mxu0 }
 0x298   : > { %1137 = vst.msk [vmem:[%s1802_s27 + $0xa0] sm:$0xff] %vm1116_vm1, %v1058_v9  ;;  %v1073_v12 = vadd.f32 %v1482_v11, %v1795_v10 }
 0x299   : > { %v1067_v13 = vpop.f32.mrf.mxu0 }
 0x29a   : > { %1140 = vst.msk [vmem:[%s1802_s27 + $0xb8] sm:$0xff] %vm1116_vm1, %v1073_v12  ;;  %v1068_v14 = vadd.f32 %v1795_v10, %v1067_v13 }
 0x29b   : > { %v1485_v15 = vpop.f32.mrf.mxu0 }
 0x29c   : > { %1139 = vst.msk [vmem:[%s1802_s27 + $0xb0] sm:$0xff] %vm1116_vm1, %v1068_v14  ;;  %v1083_v16 = vadd.f32 %v1485_v15, %v1795_v10 }
 0x29d   : > { %v1077_v17 = vpop.f32.mrf.mxu0 }
 0x29e   : > { %1142 = vst.msk [vmem:[%s1802_s27 + $0xc8] sm:$0xff] %vm1116_vm1, %v1083_v16  ;;  %v1078_v18 = vadd.f32 %v1795_v10, %v1077_v17 }
 0x29f   : > { %v1488_v20 = vpop.f32.mrf.mxu0 }
 0x2a0   : > { %1141 = vst.msk [vmem:[%s1802_s27 + $0xc0] sm:$0xff] %vm1116_vm1, %v1078_v18  ;;  %v1093_v21 = vadd.f32 %v1488_v20, %v1795_v10 }
 0x2a1   : > { %v1087_v22 = vpop.f32.mrf.mxu0 }
 0x2a2   : > { %1144 = vst.msk [vmem:[%s1802_s27 + $0xd8] sm:$0xff] %vm1116_vm1, %v1093_v21  ;;  %v1088_v23 = vadd.f32 %v1795_v10, %v1087_v22 }
 0x2a3   : > { %v1491_v24 = vpop.f32.mrf.mxu0 }
 0x2a4   : > { %1143 = vst.msk [vmem:[%s1802_s27 + $0xd0] sm:$0xff] %vm1116_vm1, %v1088_v23  ;;  %v1103_v25 = vadd.f32 %v1491_v24, %v1795_v10 }
 0x2a5   : > { %v1097_v26 = vpop.f32.mrf.mxu0 }
 0x2a6   : > { %1146 = vst.msk [vmem:[%s1802_s27 + $0xe8] sm:$0xff] %vm1116_vm1, %v1103_v25  ;;  %v1098_v27 = vadd.f32 %v1795_v10, %v1097_v26 }
 0x2a7   : > { %v1494_v29 = vpop.f32.mrf.mxu0 }
 0x2a8   : > { %1145 = vst.msk [vmem:[%s1802_s27 + $0xe0] sm:$0xff] %vm1116_vm1, %v1098_v27  ;;  %v1113_v30 = vadd.f32 %v1494_v29, %v1795_v10 }
 0x2a9   : > { %v1107_v31 = vpop.f32.mrf.mxu0 }
 0x2aa   : > { %1148 = vst.msk [vmem:[%s1802_s27 + $0xf8] sm:$0xff] %vm1116_vm1, %v1113_v30  ;;  %v1108_v59 = vadd.f32 %v1795_v10, %v1107_v31 }
 0x2ac   : > { %1147 = vst.msk [vmem:[%s1802_s27 + $0xf0] sm:$0xff] %vm1116_vm1, %v1108_v59 }
 0x2ad PF: > { %s17_s24 = sadd.s32 1, %s1520_s24  }
 0x2ae   : > { %p14_p4 = scmp.ge.s32.totalorder %s17_s24, 4  }
 0x2b0   :  { %16 = sbr.rel (!%p14_p4) target bundleno = 1 (0x1), region = 78 }

</bundles_post_ra>
